<compile_context>
chip_gen: v6e
topology: v6e:2x2x1
jax: 0.10.0
libtpu: 0.0.40
codegen_flags: <defaults>
</compile_context>

<pallas_src>
import math

import jax
import jax.numpy as jnp
from jax import lax
from jax.experimental import pallas as pl
from jax.experimental.pallas import tpu as pltpu

WIN = 9          # window size per spatial dim (module default for 2D: [9, 9])
EPS = 1e-5


def _round_up(x, m):
    return (x + m - 1) // m * m


def _make_kernel(Bt, H, W, H_pad, W_pad, Hp_pad, Wp_pad):
    """Build the kernel closure over the static shape parameters."""
    inv_win = 1.0 / float(WIN * WIN)
    n_row_tiles = H_pad // 8

    def kernel(i_ref, j_ref, out_ref):
        # ---- band matrices, generated on the fly (cheap, no VMEM buffers) ----
        h_idx = lax.broadcasted_iota(jnp.int32, (H_pad, Hp_pad), 0)
        p_idx = lax.broadcasted_iota(jnp.int32, (H_pad, Hp_pad), 1)
        d = p_idx - h_idx
        ahT = ((d >= 0) & (d < WIN) & (h_idx < H)).astype(jnp.float32)  # (H_pad, Hp_pad)

        q_idx = lax.broadcasted_iota(jnp.int32, (Wp_pad, W_pad), 0)
        w_idx = lax.broadcasted_iota(jnp.int32, (Wp_pad, W_pad), 1)
        e = q_idx - w_idx
        aw = ((e >= 0) & (e < WIN) & (w_idx < W)).astype(jnp.float32)   # (Wp_pad, W_pad)

        # ---- inputs: Bt padded images, already row-stacked as 2D -------------
        I = i_ref[...]                                    # (Bt*Hp_pad, Wp_pad)
        J = j_ref[...]

        # One tall MXU matmul for the Aw stage covering all 5 stats x Bt images
        # (stat-major, batch-minor row stacking).
        stack = jnp.concatenate([I, J, I * I, J * J, I * J], axis=0)
        t = jnp.dot(stack, aw, preferred_element_type=jnp.float32)  # (5*Bt*Hp_pad, W_pad)

        def box(stat, b):
            off = (stat * Bt + b) * Hp_pad                # static, tile-aligned
            return jnp.dot(ahT, t[off:off + Hp_pad, :],
                           preferred_element_type=jnp.float32)       # (H_pad, W_pad)

        # Accumulate per-step partial sums into a lane-dense (8, W_pad) tile:
        # pure VPU adds, no XLU reduction, no masked narrow stores.
        cc_fold = jnp.zeros((8, W_pad), jnp.float32)
        for b in range(Bt):
            i_sum = box(0, b)
            j_sum = box(1, b)
            i2_sum = box(2, b)
            j2_sum = box(3, b)
            ij_sum = box(4, b)

            # Algebraically simplified (identical to the reference formulas):
            #   cross = IJ - I_sum*J_sum/81 ; var = X2 - X_sum^2/81
            cross = ij_sum - i_sum * j_sum * inv_win
            i_var = i2_sum - i_sum * i_sum * inv_win
            j_var = j2_sum - j_sum * j_sum * inv_win
            cc = (cross * cross) * pl.reciprocal(i_var * j_var + EPS, approx=True)

            for tile in range(n_row_tiles):               # fold sublane tiles
                cc_fold = cc_fold + cc[tile * 8:(tile + 1) * 8, :]

        out_ref[0] = cc_fold

    return kernel


def ncc_vxm_loss(y_true, y_pred, *, max_batch_per_step=8,
                 vmem_budget_bytes=10 << 20):
    """y_true, y_pred: [B, 1, H, W] float32 (NCHW). Returns the scalar loss."""
    assert y_true.shape == y_pred.shape
    B, C, H, W = y_true.shape
    assert C == 1, "ones filter [1,1,9,9] implies a single input channel"
    pad = WIN // 2
    Hp, Wp = H + 2 * pad, W + 2 * pad

    # Aligned sizes: sublane (8) for row dims, lane (128) for column dims.
    H_pad = _round_up(H, 8)
    W_pad = _round_up(W, 128)
    Hp_pad = _round_up(Hp, 8)
    Wp_pad = _round_up(Wp, 128)

    # Batch elements per grid step: largest divisor of B whose working set
    # (double-buffered inputs + stacked matmul temporaries) fits a conservative
    # VMEM budget (safe for v5e's 16 MiB scoped default; v6e/v7x have >=32 MiB).
    per_batch = 4 * (4 * Hp_pad * Wp_pad      # 2 inputs x 2 pipeline buffers
                     + 5 * Hp_pad * Wp_pad    # stacked stage-1 operand
                     + 5 * Hp_pad * W_pad     # stage-1 result
                     + 6 * H_pad * W_pad)     # box results + cc temporaries
    Bt = 1
    for cand in range(min(B, max_batch_per_step), 0, -1):
        if B % cand == 0 and cand * per_batch <= vmem_budget_bytes:
            Bt = cand
            break
    num_steps = B // Bt

    def pad_img(x):
        xi = x[:, 0].astype(jnp.float32)
        xi = jnp.pad(xi, ((0, 0),
                          (pad, Hp_pad - H - pad),
                          (pad, Wp_pad - W - pad)))
        return xi.reshape(B * Hp_pad, Wp_pad)             # row-stacked 2D layout

    I = pad_img(y_true)
    J = pad_img(y_pred)

    kernel = _make_kernel(Bt, H, W, H_pad, W_pad, Hp_pad, Wp_pad)

    partials = pl.pallas_call(
        kernel,
        out_shape=jax.ShapeDtypeStruct((num_steps, 8, W_pad), jnp.float32),
        grid_spec=pltpu.PrefetchScalarGridSpec(
            num_scalar_prefetch=0,
            grid=(num_steps,),
            in_specs=[
                pl.BlockSpec((Bt * Hp_pad, Wp_pad), lambda b: (b, 0)),
                pl.BlockSpec((Bt * Hp_pad, Wp_pad), lambda b: (b, 0)),
            ],
            out_specs=pl.BlockSpec((1, 8, W_pad), lambda b: (b, 0, 0)),
        ),
        compiler_params=pltpu.CompilerParams(
            dimension_semantics=("parallel",)),           # independent per step
    )(I, J)

    # Padded cc entries are exactly zero, so the sum equals the reference sum.
    return -jnp.sum(partials) / jnp.float32(B * C * H * W)


def _reference_loss(y_true, y_pred):
    """Pure-JAX reference mirroring the PyTorch module (for verification)."""
    pad = WIN // 2
    filt = jnp.ones((1, 1, WIN, WIN), jnp.float32)

    def conv(x):
        return lax.conv_general_dilated(
            x.astype(jnp.float32), filt, window_strides=(1, 1),
            padding=((pad, pad), (pad, pad)),
            dimension_numbers=("NCHW", "OIHW", "NCHW"))

    Ii, Ji = y_true.astype(jnp.float32), y_pred.astype(jnp.float32)
    I_sum, J_sum = conv(Ii), conv(Ji)
    I2_sum, J2_sum, IJ_sum = conv(Ii * Ii), conv(Ji * Ji), conv(Ii * Ji)
    win_size = float(WIN * WIN)
    u_I, u_J = I_sum / win_size, J_sum / win_size
    cross = IJ_sum - u_J * I_sum - u_I * J_sum + u_I * u_J * win_size
    I_var = I2_sum - 2 * u_I * I_sum + u_I * u_I * win_size
    J_var = J2_sum - 2 * u_J * J_sum + u_J * u_J * win_size
    cc = cross * cross / (I_var * J_var + 1e-5)
    return -jnp.mean(cc)


if __name__ == "__main__":
    B, C, H, W = 2, 1, 16, 16
    key = jax.random.PRNGKey(0)
    k1, k2 = jax.random.split(key)
    y_true = jax.random.normal(k1, (B, C, H, W), dtype=jnp.float32)
    y_pred = jax.random.normal(k2, (B, C, H, W), dtype=jnp.float32)

    loss_fn = jax.jit(ncc_vxm_loss)
    loss = jax.block_until_ready(loss_fn(y_true, y_pred))
    ref = jax.block_until_ready(_reference_loss(y_true, y_pred))

    assert bool(jnp.isfinite(loss))
    # approx-reciprocal + reordered accumulation => keep a small numeric margin
    assert abs(float(loss) - float(ref)) < 5e-4, (float(loss), float(ref))
    print("KERNEL_OK")
</pallas_src>

<mosaic_0001>
module attributes {stable_mosaic.version = 11 : i64} {
  func.func @kernel(%arg0: i32, %arg1: memref<48x128xf32, #tpu.memory_space<vmem>>, %arg2: memref<48x128xf32, #tpu.memory_space<vmem>>, %arg3: memref<1x8x128xf32, #tpu.memory_space<vmem>>) attributes {dimension_semantics = [#tpu.dimension_semantics<parallel>], iteration_bounds = array<i64: 1>, scalar_prefetch = 0 : i64, scratch_operands = 0 : i64, tpu.core_type = #tpu.core_type<tc>, window_params = [{transform_indices = @transform_0, window_bounds = array<i64: 48, 128>}, {transform_indices = @transform_1, window_bounds = array<i64: 48, 128>}, {transform_indices = @transform_2, window_bounds = array<i64: 1, 8, 128>}]} {
    %0 = tpu.iota {dimensions = array<i32: 0>} : vector<16x24xi32>
    %1 = tpu.iota {dimensions = array<i32: 1>} : vector<16x24xi32>
    %2 = arith.subi %1, %0 : vector<16x24xi32>
    %c0_i32 = arith.constant 0 : i32
    %3 = vector.broadcast %c0_i32 : i32 to vector<16x24xi32>
    %4 = arith.cmpi sge, %2, %3 : vector<16x24xi32>
    %c9_i32 = arith.constant 9 : i32
    %5 = vector.broadcast %c9_i32 : i32 to vector<16x24xi32>
    %6 = arith.cmpi slt, %2, %5 : vector<16x24xi32>
    %7 = arith.andi %4, %6 : vector<16x24xi1>
    %c16_i32 = arith.constant 16 : i32
    %8 = vector.broadcast %c16_i32 : i32 to vector<16x24xi32>
    %9 = arith.cmpi slt, %0, %8 : vector<16x24xi32>
    %10 = arith.andi %7, %9 : vector<16x24xi1>
    %11 = arith.extui %10 : vector<16x24xi1> to vector<16x24xi32>
    %12 = arith.sitofp %11 : vector<16x24xi32> to vector<16x24xf32>
    %13 = tpu.iota {dimensions = array<i32: 0>} : vector<128x128xi32>
    %14 = tpu.iota {dimensions = array<i32: 1>} : vector<128x128xi32>
    %15 = arith.subi %13, %14 : vector<128x128xi32>
    %c0_i32_0 = arith.constant 0 : i32
    %16 = vector.broadcast %c0_i32_0 : i32 to vector<128x128xi32>
    %17 = arith.cmpi sge, %15, %16 : vector<128x128xi32>
    %c9_i32_1 = arith.constant 9 : i32
    %18 = vector.broadcast %c9_i32_1 : i32 to vector<128x128xi32>
    %19 = arith.cmpi slt, %15, %18 : vector<128x128xi32>
    %20 = arith.andi %17, %19 : vector<128x128xi1>
    %c16_i32_2 = arith.constant 16 : i32
    %21 = vector.broadcast %c16_i32_2 : i32 to vector<128x128xi32>
    %22 = arith.cmpi slt, %14, %21 : vector<128x128xi32>
    %23 = arith.andi %20, %22 : vector<128x128xi1>
    %24 = arith.extui %23 : vector<128x128xi1> to vector<128x128xi32>
    %25 = arith.sitofp %24 : vector<128x128xi32> to vector<128x128xf32>
    %c0 = arith.constant 0 : index
    %c0_3 = arith.constant 0 : index
    %26 = vector.load %arg1[%c0, %c0_3] : memref<48x128xf32, #tpu.memory_space<vmem>>, vector<48x128xf32>
    %c0_4 = arith.constant 0 : index
    %c0_5 = arith.constant 0 : index
    %27 = vector.load %arg2[%c0_4, %c0_5] : memref<48x128xf32, #tpu.memory_space<vmem>>, vector<48x128xf32>
    %28 = arith.mulf %26, %26 : vector<48x128xf32>
    %29 = arith.mulf %27, %27 : vector<48x128xf32>
    %30 = arith.mulf %26, %27 : vector<48x128xf32>
    %31 = tpu.concatenate %26, %27, %28, %29, %30 in 0 : vector<48x128xf32>, vector<48x128xf32>, vector<48x128xf32>, vector<48x128xf32>, vector<48x128xf32> -> vector<240x128xf32>
    %cst = arith.constant dense<0.000000e+00> : vector<240x128xf32>
    %32 = tpu.matmul %31, %25, %cst {dimension_numbers = #tpu.dot_dimension_numbers<[1], [0], [0], [1], [0, 0, 1, 1], [], []>} : vector<240x128xf32>, vector<128x128xf32>, vector<240x128xf32> -> vector<240x128xf32>
    %cst_6 = arith.constant 0.000000e+00 : f32
    %33 = vector.broadcast %cst_6 : f32 to vector<8x128xf32>
    %34 = vector.extract_strided_slice %32 {offsets = [0, 0], sizes = [24, 128], strides = [1, 1]} : vector<240x128xf32> to vector<24x128xf32>
    %cst_7 = arith.constant dense<0.000000e+00> : vector<16x128xf32>
    %35 = tpu.matmul %12, %34, %cst_7 {dimension_numbers = #tpu.dot_dimension_numbers<[1], [0], [0], [1], [0, 0, 1, 1], [], []>} : vector<16x24xf32>, vector<24x128xf32>, vector<16x128xf32> -> vector<16x128xf32>
    %36 = vector.extract_strided_slice %32 {offsets = [48, 0], sizes = [24, 128], strides = [1, 1]} : vector<240x128xf32> to vector<24x128xf32>
    %cst_8 = arith.constant dense<0.000000e+00> : vector<16x128xf32>
    %37 = tpu.matmul %12, %36, %cst_8 {dimension_numbers = #tpu.dot_dimension_numbers<[1], [0], [0], [1], [0, 0, 1, 1], [], []>} : vector<16x24xf32>, vector<24x128xf32>, vector<16x128xf32> -> vector<16x128xf32>
    %38 = vector.extract_strided_slice %32 {offsets = [96, 0], sizes = [24, 128], strides = [1, 1]} : vector<240x128xf32> to vector<24x128xf32>
    %cst_9 = arith.constant dense<0.000000e+00> : vector<16x128xf32>
    %39 = tpu.matmul %12, %38, %cst_9 {dimension_numbers = #tpu.dot_dimension_numbers<[1], [0], [0], [1], [0, 0, 1, 1], [], []>} : vector<16x24xf32>, vector<24x128xf32>, vector<16x128xf32> -> vector<16x128xf32>
    %40 = vector.extract_strided_slice %32 {offsets = [144, 0], sizes = [24, 128], strides = [1, 1]} : vector<240x128xf32> to vector<24x128xf32>
    %cst_10 = arith.constant dense<0.000000e+00> : vector<16x128xf32>
    %41 = tpu.matmul %12, %40, %cst_10 {dimension_numbers = #tpu.dot_dimension_numbers<[1], [0], [0], [1], [0, 0, 1, 1], [], []>} : vector<16x24xf32>, vector<24x128xf32>, vector<16x128xf32> -> vector<16x128xf32>
    %42 = vector.extract_strided_slice %32 {offsets = [192, 0], sizes = [24, 128], strides = [1, 1]} : vector<240x128xf32> to vector<24x128xf32>
    %cst_11 = arith.constant dense<0.000000e+00> : vector<16x128xf32>
    %43 = tpu.matmul %12, %42, %cst_11 {dimension_numbers = #tpu.dot_dimension_numbers<[1], [0], [0], [1], [0, 0, 1, 1], [], []>} : vector<16x24xf32>, vector<24x128xf32>, vector<16x128xf32> -> vector<16x128xf32>
    %44 = arith.mulf %35, %37 : vector<16x128xf32>
    %cst_12 = arith.constant 0.0123456791 : f32
    %45 = vector.broadcast %cst_12 : f32 to vector<16x128xf32>
    %46 = arith.mulf %44, %45 : vector<16x128xf32>
    %47 = arith.subf %43, %46 : vector<16x128xf32>
    %48 = arith.mulf %35, %35 : vector<16x128xf32>
    %cst_13 = arith.constant 0.0123456791 : f32
    %49 = vector.broadcast %cst_13 : f32 to vector<16x128xf32>
    %50 = arith.mulf %48, %49 : vector<16x128xf32>
    %51 = arith.subf %39, %50 : vector<16x128xf32>
    %52 = arith.mulf %37, %37 : vector<16x128xf32>
    %cst_14 = arith.constant 0.0123456791 : f32
    %53 = vector.broadcast %cst_14 : f32 to vector<16x128xf32>
    %54 = arith.mulf %52, %53 : vector<16x128xf32>
    %55 = arith.subf %41, %54 : vector<16x128xf32>
    %56 = arith.mulf %47, %47 : vector<16x128xf32>
    %57 = arith.mulf %51, %55 : vector<16x128xf32>
    %cst_15 = arith.constant 9.99999974E-6 : f32
    %58 = vector.broadcast %cst_15 : f32 to vector<16x128xf32>
    %59 = arith.addf %57, %58 : vector<16x128xf32>
    %60 = tpu.reciprocal %59 {approx = true} : vector<16x128xf32> -> vector<16x128xf32>
    %61 = arith.mulf %56, %60 : vector<16x128xf32>
    %62 = vector.extract_strided_slice %61 {offsets = [0, 0], sizes = [8, 128], strides = [1, 1]} : vector<16x128xf32> to vector<8x128xf32>
    %63 = arith.addf %33, %62 : vector<8x128xf32>
    %64 = vector.extract_strided_slice %61 {offsets = [8, 0], sizes = [8, 128], strides = [1, 1]} : vector<16x128xf32> to vector<8x128xf32>
    %65 = arith.addf %63, %64 : vector<8x128xf32>
    %66 = vector.extract_strided_slice %32 {offsets = [24, 0], sizes = [24, 128], strides = [1, 1]} : vector<240x128xf32> to vector<24x128xf32>
    %cst_16 = arith.constant dense<0.000000e+00> : vector<16x128xf32>
    %67 = tpu.matmul %12, %66, %cst_16 {dimension_numbers = #tpu.dot_dimension_numbers<[1], [0], [0], [1], [0, 0, 1, 1], [], []>} : vector<16x24xf32>, vector<24x128xf32>, vector<16x128xf32> -> vector<16x128xf32>
    %68 = vector.extract_strided_slice %32 {offsets = [72, 0], sizes = [24, 128], strides = [1, 1]} : vector<240x128xf32> to vector<24x128xf32>
    %cst_17 = arith.constant dense<0.000000e+00> : vector<16x128xf32>
    %69 = tpu.matmul %12, %68, %cst_17 {dimension_numbers = #tpu.dot_dimension_numbers<[1], [0], [0], [1], [0, 0, 1, 1], [], []>} : vector<16x24xf32>, vector<24x128xf32>, vector<16x128xf32> -> vector<16x128xf32>
    %70 = vector.extract_strided_slice %32 {offsets = [120, 0], sizes = [24, 128], strides = [1, 1]} : vector<240x128xf32> to vector<24x128xf32>
    %cst_18 = arith.constant dense<0.000000e+00> : vector<16x128xf32>
    %71 = tpu.matmul %12, %70, %cst_18 {dimension_numbers = #tpu.dot_dimension_numbers<[1], [0], [0], [1], [0, 0, 1, 1], [], []>} : vector<16x24xf32>, vector<24x128xf32>, vector<16x128xf32> -> vector<16x128xf32>
    %72 = vector.extract_strided_slice %32 {offsets = [168, 0], sizes = [24, 128], strides = [1, 1]} : vector<240x128xf32> to vector<24x128xf32>
    %cst_19 = arith.constant dense<0.000000e+00> : vector<16x128xf32>
    %73 = tpu.matmul %12, %72, %cst_19 {dimension_numbers = #tpu.dot_dimension_numbers<[1], [0], [0], [1], [0, 0, 1, 1], [], []>} : vector<16x24xf32>, vector<24x128xf32>, vector<16x128xf32> -> vector<16x128xf32>
    %74 = vector.extract_strided_slice %32 {offsets = [216, 0], sizes = [24, 128], strides = [1, 1]} : vector<240x128xf32> to vector<24x128xf32>
    %cst_20 = arith.constant dense<0.000000e+00> : vector<16x128xf32>
    %75 = tpu.matmul %12, %74, %cst_20 {dimension_numbers = #tpu.dot_dimension_numbers<[1], [0], [0], [1], [0, 0, 1, 1], [], []>} : vector<16x24xf32>, vector<24x128xf32>, vector<16x128xf32> -> vector<16x128xf32>
    %76 = arith.mulf %67, %69 : vector<16x128xf32>
    %cst_21 = arith.constant 0.0123456791 : f32
    %77 = vector.broadcast %cst_21 : f32 to vector<16x128xf32>
    %78 = arith.mulf %76, %77 : vector<16x128xf32>
    %79 = arith.subf %75, %78 : vector<16x128xf32>
    %80 = arith.mulf %67, %67 : vector<16x128xf32>
    %cst_22 = arith.constant 0.0123456791 : f32
    %81 = vector.broadcast %cst_22 : f32 to vector<16x128xf32>
    %82 = arith.mulf %80, %81 : vector<16x128xf32>
    %83 = arith.subf %71, %82 : vector<16x128xf32>
    %84 = arith.mulf %69, %69 : vector<16x128xf32>
    %cst_23 = arith.constant 0.0123456791 : f32
    %85 = vector.broadcast %cst_23 : f32 to vector<16x128xf32>
    %86 = arith.mulf %84, %85 : vector<16x128xf32>
    %87 = arith.subf %73, %86 : vector<16x128xf32>
    %88 = arith.mulf %79, %79 : vector<16x128xf32>
    %89 = arith.mulf %83, %87 : vector<16x128xf32>
    %cst_24 = arith.constant 9.99999974E-6 : f32
    %90 = vector.broadcast %cst_24 : f32 to vector<16x128xf32>
    %91 = arith.addf %89, %90 : vector<16x128xf32>
    %92 = tpu.reciprocal %91 {approx = true} : vector<16x128xf32> -> vector<16x128xf32>
    %93 = arith.mulf %88, %92 : vector<16x128xf32>
    %94 = vector.extract_strided_slice %93 {offsets = [0, 0], sizes = [8, 128], strides = [1, 1]} : vector<16x128xf32> to vector<8x128xf32>
    %95 = arith.addf %65, %94 : vector<8x128xf32>
    %96 = vector.extract_strided_slice %93 {offsets = [8, 0], sizes = [8, 128], strides = [1, 1]} : vector<16x128xf32> to vector<8x128xf32>
    %97 = arith.addf %95, %96 : vector<8x128xf32>
    %c0_25 = arith.constant 0 : index
    %c0_26 = arith.constant 0 : index
    %c0_27 = arith.constant 0 : index
    %98 = vector.load %arg3[%c0_25, %c0_26, %c0_27] : memref<1x8x128xf32, #tpu.memory_space<vmem>>, vector<1x8x128xf32>
    %99 = vector.shape_cast %98 : vector<1x8x128xf32> to vector<8x128xf32>
    %100 = vector.shape_cast %97 : vector<8x128xf32> to vector<1x8x128xf32>
    tpu.vector_store %arg3[%c0_25, %c0_26, %c0_27], %100 {strides = array<i32>} : memref<1x8x128xf32, #tpu.memory_space<vmem>>, vector<1x8x128xf32>,
    return
  }
  func.func @transform_0(%arg0: i32) -> (i32, i32) {
    %c0_i32 = arith.constant 0 : i32
    %c0_i32_0 = arith.constant 0 : i32
    return %arg0, %c0_i32 : i32, i32
  }
  func.func @transform_1(%arg0: i32) -> (i32, i32) {
    %c0_i32 = arith.constant 0 : i32
    %c0_i32_0 = arith.constant 0 : i32
    return %arg0, %c0_i32 : i32, i32
  }
  func.func @transform_2(%arg0: i32) -> (i32, i32, i32) {
    %c0_i32 = arith.constant 0 : i32
    %c0_i32_0 = arith.constant 0 : i32
    %c0_i32_1 = arith.constant 0 : i32
    return %arg0, %c0_i32, %c0_i32_0 : i32, i32, i32
  }
}

</mosaic_0001>

<bundles_post_ra>
// kernel: ncc_vxm_loss.1
= control target key start
LH: loop header
LB: loop body
LE: loop exit
PB: predicated region body
PF: predicated region fallthrough
CT: control target
= control target key end

     0   :  { %v11_v0 = vlaneseq  ;;  %v1553_v16 = vmov 1.0   ;;  %v1554_v38 = vmov 0.0   ;;  %s1785_s0 = inlined_call_operand.vmem [shape: f32[48,128], index: 0, kind: input, shape index: {}]   ;;  %s1786_s1 = inlined_call_operand.vmem [shape: f32[48,128], index: 1, kind: input, shape index: {}]   ;;  %s1787_s2 = inlined_call_operand.vmem [shape: f32[1,8,128], index: 2, kind: output, shape index: {}]  }
   0x1   :  { %v1573_v1 = vld [vmem:[%s1785_s0] sm:$0xff]  ;;  %v160_v40 = vld [vmem:[%s1785_s0 + $0x8] sm:$0xff]  ;;  %v161_v41 = vld [vmem:[%s1785_s0 + $0x10] sm:$0xff] }
   0x2   :  { %v1575_v2 = vshrl.u32 %v11_v0, 7  ;;  %v1577_v3 = vand.u32 127, %v11_v0  ;;  %1408 = vmatprep.mubr.f32.mxu0 %v1573_v1  ;;  %v162_v42 = vld [vmem:[%s1785_s0 + $0x18] sm:$0xff]  ;;  %v163_v43 = vld [vmem:[%s1785_s0 + $0x20] sm:$0xff]  ;;  %v164_v44 = vld [vmem:[%s1785_s0 + $0x28] sm:$0xff]  ;;  %v171_v51 = vmul.f32 %v1573_v1, %v1573_v1  ;;  %v172_v52 = vmul.f32 %v160_v40, %v160_v40 }
   0x3   :  { %v165_v45 = vld [vmem:[%s1786_s1] sm:$0xff]  ;;  %v166_v46 = vld [vmem:[%s1786_s1 + $0x8] sm:$0xff]  ;;  %v167_v47 = vld [vmem:[%s1786_s1 + $0x10] sm:$0xff]  ;;  %v173_v53 = vmul.f32 %v161_v41, %v161_v41  ;;  %v174_v54 = vmul.f32 %v162_v42, %v162_v42  ;;  %v175_v55 = vmul.f32 %v163_v43, %v163_v43  ;;  %v176_v56 = vmul.f32 %v164_v44, %v164_v44 }
   0x4   :  { %v45_v4 = vadd.s32 120, %v1575_v2  ;;  %v44_v5 = vadd.s32 112, %v1575_v2  ;;  %v43_v6 = vadd.s32 104, %v1575_v2  ;;  %v42_v7 = vadd.s32 96, %v1575_v2  ;;  %v168_v48 = vld [vmem:[%s1786_s1 + $0x18] sm:$0xff]  ;;  %v169_v49 = vld [vmem:[%s1786_s1 + $0x20] sm:$0xff] }
   0x5   :  { %v41_v11 = vadd.s32 88, %v1575_v2  ;;  %vm110_vm0 = vcmp.lt.s32.totalorder %v1577_v3, 16  ;;  %v40_v13 = vadd.s32 80, %v1575_v2  ;;  %v39_v14 = vadd.s32 72, %v1575_v2  ;;  %v170_v50 = vld [vmem:[%s1786_s1 + $0x28] sm:$0xff] }
   0x6   :  { %v61_v8 = vsub.s32 %v45_v4, %v1577_v3  ;;  %v60_v9 = vsub.s32 %v44_v5, %v1577_v3  ;;  %v59_v10 = vsub.s32 %v43_v6, %v1577_v3  ;;  %v58_v12 = vsub.s32 %v42_v7, %v1577_v3 }
   0x7   :  { %v57_v15 = vsub.s32 %v41_v11, %v1577_v3  ;;  %v56_v17 = vsub.s32 %v40_v13, %v1577_v3  ;;  %v38_v18 = vadd.s32 64, %v1575_v2  ;;  %v55_v19 = vsub.s32 %v39_v14, %v1577_v3 }
   0x8   :  { %vm77_vm1 = vcmp.ge.s32.totalorder %v61_v8, 0  ;;  %vm93_vm2 = vcmp.lt.s32.totalorder %v61_v8, 9  ;;  %vm76_vm3 = vcmp.ge.s32.totalorder %v60_v9, 0  ;;  %vm92_vm4 = vcmp.lt.s32.totalorder %v60_v9, 9 }
   0x9   :  { %vm109_vm5 = vmand %vm77_vm1, %vm93_vm2  ;;  %vm75_vm7 = vcmp.ge.s32.totalorder %v59_v10, 0  ;;  %vm91_vm8 = vcmp.lt.s32.totalorder %v59_v10, 9  ;;  %vm74_vm11 = vcmp.ge.s32.totalorder %v58_v12, 0  ;;  %vm90_vm12 = vcmp.lt.s32.totalorder %v58_v12, 9 }
   0xa   :  { %vm126_vm6 = vmand %vm109_vm5, %vm110_vm0  ;;  %vm73_vm15 = vcmp.ge.s32.totalorder %v57_v15, 0  ;;  %vm89_vm1 = vcmp.lt.s32.totalorder %v57_v15, 9  ;;  %v37_v20 = vadd.s32 56, %v1575_v2  ;;  %vm88_vm5 = vcmp.lt.s32.totalorder %v56_v17, 9 }
   0xb   :  { %1376 = vmatprep.subr.msk.mxu0 %vm126_vm6, %v1553_v16  ;;  %vm108_vm9 = vmand %vm76_vm3, %vm92_vm4  ;;  %vm72_vm3 = vcmp.ge.s32.totalorder %v56_v17, 0  ;;  %v54_v21 = vsub.s32 %v38_v18, %v1577_v3  ;;  %v36_v22 = vadd.s32 48, %v1575_v2  ;;  %v13_v23 = vadd.s32 8, %v1575_v2 }
   0xc   :  { %1377 = vmatpush3.msk.msra.mxu0 %vm126_vm6, %v1553_v16  ;;  %vm125_vm10 = vmand %vm108_vm9, %vm110_vm0  ;;  %v53_v24 = vsub.s32 %v37_v20, %v1577_v3  ;;  %v35_v25 = vadd.s32 40, %v1575_v2  ;;  %v1622_v26 = vsub.s32 %v1577_v3, %v1575_v2  ;;  %v34_v29 = vadd.s32 32, %v1575_v2 }
   0xd   :  { %1378 = vmatprep.subr.msk.mxu0 %vm125_vm10, %v1553_v16  ;;  %vm107_vm13 = vmand %vm75_vm7, %vm91_vm8  ;;  %vm71_vm7 = vcmp.ge.s32.totalorder %v55_v19, 0  ;;  %vm87_vm8 = vcmp.lt.s32.totalorder %v55_v19, 9  ;;  %v1625_v27 = vsub.s32 %v1577_v3, %v13_v23  ;;  %v52_v28 = vsub.s32 %v36_v22, %v1577_v3 }
   0xe   :  { %1379 = vmatpush3.msk.msra.mxu0 %vm125_vm10, %v1553_v16  ;;  %vm124_vm14 = vmand %vm107_vm13, %vm110_vm0  ;;  %vm86_vm13 = vcmp.lt.s32.totalorder %v54_v21, 9  ;;  %v51_v30 = vsub.s32 %v35_v25, %v1577_v3  ;;  %v33_v31 = vadd.s32 24, %v1575_v2  ;;  %v50_v32 = vsub.s32 %v34_v29, %v1577_v3 }
   0xf   :  { %1380 = vmatprep.subr.msk.mxu0 %vm124_vm14, %v1553_v16  ;;  %vm106_vm2 = vmand %vm74_vm11, %vm90_vm12  ;;  %vm70_vm12 = vcmp.ge.s32.totalorder %v54_v21, 0  ;;  %v32_v33 = vadd.s32 16, %v1575_v2  ;;  %v47_v36 = vsub.s32 %v13_v23, %v1577_v3  ;;  %v46_v37 = vsub.s32 %v1575_v2, %v1577_v3 }
  0x10   :  { %1381 = vmatpush3.msk.msra.mxu0 %vm124_vm14, %v1553_v16  ;;  %vm123_vm4 = vmand %vm106_vm2, %vm110_vm0  ;;  %vm85_vm2 = vcmp.lt.s32.totalorder %v53_v24, 9  ;;  %v49_v34 = vsub.s32 %v33_v31, %v1577_v3  ;;  %v177_v57 = vmul.f32 %v165_v45, %v165_v45  ;;  %v178_v58 = vmul.f32 %v166_v46, %v166_v46 }
  0x11   :  { %1382 = vmatprep.subr.msk.mxu0 %vm123_vm4, %v1553_v16  ;;  %vm105_vm6 = vmand %vm73_vm15, %vm89_vm1  ;;  %vm69_vm1 = vcmp.ge.s32.totalorder %v53_v24, 0  ;;  %v48_v35 = vsub.s32 %v32_v33, %v1577_v3  ;;  %v179_v59 = vmul.f32 %v167_v47, %v167_v47  ;;  %v180_v60 = vmul.f32 %v168_v48, %v168_v48 }
  0x12   :  { %1383 = vmatpush3.msk.msra.mxu0 %vm123_vm4, %v1553_v16  ;;  %vm122_vm9 = vmand %vm105_vm6, %vm110_vm0  ;;  %vm84_vm6 = vcmp.lt.s32.totalorder %v52_v28, 9  ;;  %v181_v61 = vmul.f32 %v169_v49, %v169_v49  ;;  %v182_v62 = vmul.f32 %v170_v50, %v170_v50  ;;  %v183_v63 = vmul.f32 %v165_v45, %v1573_v1 }
  0x13   :  { %1384 = vmatprep.subr.msk.mxu0 %vm122_vm9, %v1553_v16  ;;  %vm104_vm10 = vmand %vm72_vm3, %vm88_vm5  ;;  %vm68_vm5 = vcmp.ge.s32.totalorder %v52_v28, 0  ;;  %v184_v0 = vmul.f32 %v166_v46, %v160_v40  ;;  %v185_v2 = vmul.f32 %v167_v47, %v161_v41  ;;  %v186_v3 = vmul.f32 %v168_v48, %v162_v42 }
  0x14   :  { %1385 = vmatpush3.msk.msra.mxu0 %vm122_vm9, %v1553_v16  ;;  %vm121_vm11 = vmand %vm104_vm10, %vm110_vm0  ;;  %vm67_vm9 = vcmp.ge.s32.totalorder %v51_v30, 0  ;;  %vm83_vm10 = vcmp.lt.s32.totalorder %v51_v30, 9  ;;  %v187_v4 = vmul.f32 %v169_v49, %v163_v43  ;;  %v188_v5 = vmul.f32 %v170_v50, %v164_v44 }
  0x15   :  { %1386 = vmatprep.subr.msk.mxu0 %vm121_vm11, %v1553_v16  ;;  %vm103_vm14 = vmand %vm71_vm7, %vm87_vm8 }
  0x16   :  { %1387 = vmatpush3.msk.msra.mxu0 %vm121_vm11, %v1553_v16  ;;  %vm120_vm15 = vmand %vm103_vm14, %vm110_vm0  ;;  %vm82_vm14 = vcmp.lt.s32.totalorder %v50_v32, 9 }
  0x17   :  { %1388 = vmatprep.subr.msk.mxu0 %vm120_vm15, %v1553_v16  ;;  %vm102_vm3 = vmand %vm70_vm12, %vm86_vm13  ;;  %vm66_vm13 = vcmp.ge.s32.totalorder %v50_v32, 0 }
  0x18   :  { %1389 = vmatpush3.msk.msra.mxu0 %vm120_vm15, %v1553_v16  ;;  %vm119_vm4 = vmand %vm102_vm3, %vm110_vm0  ;;  %vm81_vm3 = vcmp.lt.s32.totalorder %v49_v34, 9 }
  0x19   :  { %1390 = vmatprep.subr.msk.mxu0 %vm119_vm4, %v1553_v16  ;;  %vm101_vm7 = vmand %vm69_vm1, %vm85_vm2  ;;  %vm65_vm2 = vcmp.ge.s32.totalorder %v49_v34, 0 }
  0x1a   :  { %1391 = vmatpush3.msk.msra.mxu0 %vm119_vm4, %v1553_v16  ;;  %vm118_vm8 = vmand %vm101_vm7, %vm110_vm0  ;;  %vm80_vm7 = vcmp.lt.s32.totalorder %v48_v35, 9 }
  0x1b   :  { %1392 = vmatprep.subr.msk.mxu0 %vm118_vm8, %v1553_v16  ;;  %vm100_vm11 = vmand %vm68_vm5, %vm84_vm6  ;;  %vm64_vm6 = vcmp.ge.s32.totalorder %v48_v35, 0 }
  0x1c   :  { %1393 = vmatpush3.msk.msra.mxu0 %vm118_vm8, %v1553_v16  ;;  %vm117_vm12 = vmand %vm100_vm11, %vm110_vm0  ;;  %vm19_vm11 = vcmp.ge.s32.totalorder %v1625_v27, 0 }
  0x1d   :  { %1394 = vmatprep.subr.msk.mxu0 %vm117_vm12, %v1553_v16  ;;  %vm99_vm15 = vmand %vm67_vm9, %vm83_vm10 }
  0x1e   :  { %1395 = vmatpush3.msk.msra.mxu0 %vm117_vm12, %v1553_v16  ;;  %vm116_vm1 = vmand %vm99_vm15, %vm110_vm0  ;;  %vm21_vm12 = vcmp.lt.s32.totalorder %v1625_v27, 9  ;;  %vm79_vm15 = vcmp.lt.s32.totalorder %v47_v36, 9 }
  0x1f   :  { %1396 = vmatprep.subr.msk.mxu0 %vm116_vm1, %v1553_v16  ;;  %vm98_vm4 = vmand %vm66_vm13, %vm82_vm14  ;;  %vm63_vm14 = vcmp.ge.s32.totalorder %v47_v36, 0 }
  0x20   :  { %1397 = vmatpush3.msk.msra.mxu0 %vm116_vm1, %v1553_v16  ;;  %vm115_vm5 = vmand %vm98_vm4, %vm110_vm0 }
  0x21   :  { %1398 = vmatprep.subr.msk.mxu0 %vm115_vm5, %v1553_v16  ;;  %vm97_vm8 = vmand %vm65_vm2, %vm81_vm3  ;;  %vm62_vm2 = vcmp.ge.s32.totalorder %v46_v37, 0 }
  0x22   :  { %1399 = vmatpush3.msk.msra.mxu0 %vm115_vm5, %v1553_v16  ;;  %vm114_vm9 = vmand %vm97_vm8, %vm110_vm0  ;;  %vm404_vm8 = vcmask 195584  }
  0x23   :  { %1400 = vmatprep.subr.msk.mxu0 %vm114_vm9, %v1553_v16  ;;  %vm96_vm10 = vmand %vm64_vm6, %vm80_vm7  ;;  %vm20_vm6 = vcmp.lt.s32.totalorder %v1622_v26, 9 }
  0x24   :  { %1401 = vmatpush3.msk.msra.mxu0 %vm114_vm9, %v1553_v16  ;;  %vm113_vm13 = vmand %vm96_vm10, %vm110_vm0 }
  0x25   :  { %1402 = vmatprep.subr.msk.mxu0 %vm113_vm13, %v1553_v16  ;;  %vm23_vm1 = vmand %vm19_vm11, %vm21_vm12 }
  0x26   :  { %1403 = vmatpush3.msk.msra.mxu0 %vm113_vm13, %v1553_v16  ;;  %v1683_v39 = vsel %vm23_vm1, 1.0, %v1554_v38  ;;  %vm95_vm3 = vmand %vm63_vm14, %vm79_vm15 }
  0x27   :  { %vm112_vm4 = vmand %vm95_vm3, %vm110_vm0 }
  0x28   :  { %1404 = vmatprep.subr.msk.mxu0 %vm112_vm4, %v1553_v16  ;;  %vm111_vm5 = vmand %vm62_vm2, %vm110_vm0  ;;  %vm18_vm0 = vcmp.ge.s32.totalorder %v1622_v26, 0 }
  0x29   :  { %1405 = vmatpush3.msk.msra.mxu0 %vm112_vm4, %v1553_v16  ;;  %vm22_vm7 = vmand %vm18_vm0, %vm20_vm6 }
  0x2a   :  { %1406 = vmatprep.subr.msk.mxu0 %vm111_vm5, %v1553_v16  ;;  %v1732_v6 = vsel %vm22_vm7, 1.0, %v1554_v38 }
  0x2b   :  { %1407 = vmatpush3.msk.msra.mxu0 %vm111_vm5, %v1553_v16  ;;  %1459 = vmatprep.mubr.msk.f32.mxu1 %vm404_vm8, %v1732_v6 }
  0x2c   :  { %1409 = vmatmul.mubr.f32.vlgmr.msra.gmra.mxu0 %v160_v40 }
  0x2d   :  { %1411 = vmatprep.mubr.f32.mxu0 %v161_v41 }
  0x30   :  { %1412 = vmatmul.mubr.f32.gmra.mxu0 %v162_v42 }
  0x31   :  { %1414 = vmatprep.mubr.f32.mxu0 %v163_v43 }
  0x34   :  { %1415 = vmatmul.mubr.f32.gmra.mxu0 %v164_v44 }
  0x35   :  { %1417 = vmatprep.mubr.f32.mxu0 %v165_v45 }
  0x38   :  { %1418 = vmatmul.mubr.f32.gmra.mxu0 %v166_v46 }
  0x39   :  { %1420 = vmatprep.mubr.f32.mxu0 %v167_v47 }
  0x3c   :  { %1421 = vmatmul.mubr.f32.gmra.mxu0 %v168_v48 }
  0x3d   :  { %1423 = vmatprep.mubr.f32.mxu0 %v169_v49 }
  0x40   :  { %1424 = vmatmul.mubr.f32.gmra.mxu0 %v170_v50 }
  0x41   :  { %1426 = vmatprep.mubr.f32.mxu0 %v171_v51 }
  0x44   :  { %1427 = vmatmul.mubr.f32.gmra.mxu0 %v172_v52 }
  0x45   :  { %1429 = vmatprep.mubr.f32.mxu0 %v173_v53 }
  0x48   :  { %1430 = vmatmul.mubr.f32.gmra.mxu0 %v174_v54 }
  0x49   :  { %1432 = vmatprep.mubr.f32.mxu0 %v175_v55 }
  0x4c   :  { %1433 = vmatmul.mubr.f32.gmra.mxu0 %v176_v56 }
  0x4d   :  { %1435 = vmatprep.mubr.f32.mxu0 %v177_v57 }
  0x50   :  { %1436 = vmatmul.mubr.f32.gmra.mxu0 %v178_v58 }
  0x51   :  { %1438 = vmatprep.mubr.f32.mxu0 %v179_v59 }
  0x54   :  { %1439 = vmatmul.mubr.f32.gmra.mxu0 %v180_v60 }
  0x55   :  { %1441 = vmatprep.mubr.f32.mxu0 %v181_v61 }
  0x58   :  { %1442 = vmatmul.mubr.f32.gmra.mxu0 %v182_v62 }
  0x59   :  { %1444 = vmatprep.mubr.f32.mxu0 %v183_v63 }
  0x5c   :  { %1445 = vmatmul.mubr.f32.gmra.mxu0 %v184_v0 }
  0x5d   :  { %1447 = vmatprep.mubr.f32.mxu0 %v185_v2 }
  0x60   :  { %1448 = vmatmul.mubr.f32.gmra.mxu0 %v186_v3 }
  0x61   :  { %1450 = vmatprep.mubr.f32.mxu0 %v187_v4 }
  0x64   :  { %1451 = vmatmul.mubr.f32.gmra.mxu0 %v188_v5 }
  0xec   :  { %v1410_v1 = vpop.f32.mrf.mxu0 }
  0xee   :  { %v255_v7 = vpop.f32.mrf.mxu0 }
  0xf0   :  { %v1736_v8 = vpop.f32.mrf.mxu0 }
  0xf2   :  { %v265_v9 = vpop.f32.mrf.mxu0 }
  0xf3   :  { %1453 = vmatprep.subr.mxu1 %v265_v9 }
  0xf4   :  { %v1416_v10 = vpop.f32.mrf.mxu0  ;;  %1454 = vmatpush3.msra.mxu1 %v265_v9 }
  0xf5   :  { %1455 = vmatprep.subr.mxu1 %v1410_v1 }
  0xf6   :  { %v275_v11 = vpop.f32.mrf.mxu0  ;;  %1456 = vmatpush3.msra.mxu1 %v1410_v1 }
  0xf7   :  { %1457 = vmatprep.subr.mxu1 %v255_v7 }
  0xf8   :  { %v1419_v12 = vpop.f32.mrf.mxu0  ;;  %1458 = vmatpush3.msra.mxu1 %v255_v7 }
  0xf9   :  { %1460 = vmatmul.mubr.msk.f32.vlgmr.msra.gmra.mxu1 %vm404_vm8, %v1683_v39 }
  0xfa   :  { %v285_v13 = vpop.f32.mrf.mxu0  ;;  %1468 = vmatprep.mubr.msk.f32.mxu1 %vm404_vm8, %v1732_v6 }
  0xfc   :  { %v1742_v14 = vpop.f32.mrf.mxu0 }
  0xfe   :  { %v295_v15 = vpop.f32.mrf.mxu0 }
  0xff   :  { %1462 = vmatprep.subr.mxu1 %v295_v15 }
 0x100   :  { %v1425_v16 = vpop.f32.mrf.mxu0  ;;  %1463 = vmatpush3.msra.mxu1 %v295_v15 }
 0x101   :  { %1464 = vmatprep.subr.mxu1 %v1419_v12 }
 0x102   :  { %v305_v17 = vpop.f32.mrf.mxu0  ;;  %1465 = vmatpush3.msra.mxu1 %v1419_v12 }
 0x103   :  { %1466 = vmatprep.subr.mxu1 %v285_v13 }
 0x104   :  { %v1428_v18 = vpop.f32.mrf.mxu0  ;;  %1467 = vmatpush3.msra.mxu1 %v285_v13 }
 0x105   :  { %1469 = vmatmul.mubr.msk.f32.vlgmr.msra.gmra.mxu1 %vm404_vm8, %v1683_v39 }
 0x106   :  { %v315_v19 = vpop.f32.mrf.mxu0  ;;  %1477 = vmatprep.mubr.msk.f32.mxu1 %vm404_vm8, %v1732_v6 }
 0x108   :  { %v1431_v20 = vpop.f32.mrf.mxu0 }
 0x10a   :  { %v325_v21 = vpop.f32.mrf.mxu0 }
 0x10b   :  { %1471 = vmatprep.subr.mxu1 %v325_v21 }
 0x10c   :  { %v1434_v22 = vpop.f32.mrf.mxu0  ;;  %1472 = vmatpush3.msra.mxu1 %v325_v21 }
 0x10d   :  { %1473 = vmatprep.subr.mxu1 %v1428_v18 }
 0x10e   :  { %v335_v23 = vpop.f32.mrf.mxu0  ;;  %1474 = vmatpush3.msra.mxu1 %v1428_v18 }
 0x10f   :  { %1475 = vmatprep.subr.mxu1 %v315_v19 }
 0x110   :  { %v1437_v24 = vpop.f32.mrf.mxu0  ;;  %1476 = vmatpush3.msra.mxu1 %v315_v19 }
 0x111   :  { %1478 = vmatmul.mubr.msk.f32.vlgmr.msra.gmra.mxu1 %vm404_vm8, %v1683_v39 }
 0x112   :  { %v345_v25 = vpop.f32.mrf.mxu0  ;;  %1486 = vmatprep.mubr.msk.f32.mxu1 %vm404_vm8, %v1732_v6 }
 0x114   :  { %v1440_v26 = vpop.f32.mrf.mxu0 }
 0x116   :  { %v355_v27 = vpop.f32.mrf.mxu0 }
 0x117   :  { %1480 = vmatprep.subr.mxu1 %v355_v27 }
 0x118   :  { %v1443_v28 = vpop.f32.mrf.mxu0  ;;  %1481 = vmatpush3.msra.mxu1 %v355_v27 }
 0x119   :  { %1482 = vmatprep.subr.mxu1 %v1437_v24 }
 0x11a   :  { %v365_v29 = vpop.f32.mrf.mxu0  ;;  %1483 = vmatpush3.msra.mxu1 %v1437_v24 }
 0x11b   :  { %1484 = vmatprep.subr.mxu1 %v345_v25 }
 0x11c   :  { %v1446_v30 = vpop.f32.mrf.mxu0  ;;  %1485 = vmatpush3.msra.mxu1 %v345_v25 }
 0x11d   :  { %1487 = vmatmul.mubr.msk.f32.vlgmr.msra.gmra.mxu1 %vm404_vm8, %v1683_v39 }
 0x11e   :  { %v375_v31 = vpop.f32.mrf.mxu0  ;;  %1495 = vmatprep.mubr.msk.f32.mxu1 %vm404_vm8, %v1732_v6 }
 0x120   :  { %v1449_v32 = vpop.f32.mrf.mxu0 }
 0x122   :  { %v385_v33 = vpop.f32.mrf.mxu0 }
 0x123   :  { %1489 = vmatprep.subr.mxu1 %v385_v33 }
 0x124   :  { %1490 = vmatpush3.msra.mxu1 %v385_v33  ;;  %v1452_v34 = vpop.f32.mrf.mxu0 }
 0x125   :  { %1491 = vmatprep.subr.mxu1 %v1446_v30 }
 0x126   :  { %1492 = vmatpush3.msra.mxu1 %v1446_v30  ;;  %v395_v35 = vpop.f32.mrf.mxu0 }
 0x127   :  { %1493 = vmatprep.subr.mxu1 %v375_v31 }
 0x128   :  { %1494 = vmatpush3.msra.mxu1 %v375_v31 }
 0x129   :  { %1496 = vmatmul.mubr.msk.f32.vlgmr.msra.gmra.mxu1 %vm404_vm8, %v1683_v39  ;;  %1498 = vmatprep.subr.mxu1 %v1416_v10 }
 0x12a   :  { %1499 = vmatpush3.msra.mxu1 %v1416_v10  ;;  %1504 = vmatprep.mubr.msk.f32.mxu1 %vm404_vm8, %v1732_v6 }
 0x12b   :  { %1500 = vmatprep.subr.mxu1 %v275_v11 }
 0x12c   :  { %1501 = vmatpush3.msra.mxu1 %v275_v11 }
 0x12d   :  { %1502 = vmatprep.subr.mxu1 %v1736_v8 }
 0x12e   :  { %1503 = vmatpush3.msra.mxu1 %v1736_v8 }
 0x12f   :  { %1505 = vmatmul.mubr.msk.f32.vlgmr.msra.gmra.mxu1 %vm404_vm8, %v1683_v39  ;;  %1507 = vmatprep.subr.mxu1 %v1425_v16 }
 0x130   :  { %1508 = vmatpush3.msra.mxu1 %v1425_v16  ;;  %1513 = vmatprep.mubr.msk.f32.mxu1 %vm404_vm8, %v1732_v6 }
 0x131   :  { %1509 = vmatprep.subr.mxu1 %v305_v17 }
 0x132   :  { %1510 = vmatpush3.msra.mxu1 %v305_v17 }
 0x133   :  { %1511 = vmatprep.subr.mxu1 %v1742_v14 }
 0x134   :  { %1512 = vmatpush3.msra.mxu1 %v1742_v14 }
 0x135   :  { %1514 = vmatmul.mubr.msk.f32.vlgmr.msra.gmra.mxu1 %vm404_vm8, %v1683_v39  ;;  %1516 = vmatprep.subr.mxu1 %v1434_v22 }
 0x136   :  { %1517 = vmatpush3.msra.mxu1 %v1434_v22  ;;  %1522 = vmatprep.mubr.msk.f32.mxu1 %vm404_vm8, %v1732_v6 }
 0x137   :  { %1518 = vmatprep.subr.mxu1 %v335_v23 }
 0x138   :  { %1519 = vmatpush3.msra.mxu1 %v335_v23 }
 0x139   :  { %1520 = vmatprep.subr.mxu1 %v1431_v20 }
 0x13a   :  { %1521 = vmatpush3.msra.mxu1 %v1431_v20 }
 0x13b   :  { %1523 = vmatmul.mubr.msk.f32.vlgmr.msra.gmra.mxu1 %vm404_vm8, %v1683_v39  ;;  %1525 = vmatprep.subr.mxu1 %v1443_v28 }
 0x13c   :  { %1526 = vmatpush3.msra.mxu1 %v1443_v28  ;;  %1531 = vmatprep.mubr.msk.f32.mxu1 %vm404_vm8, %v1732_v6 }
 0x13d   :  { %1527 = vmatprep.subr.mxu1 %v365_v29 }
 0x13e   :  { %1528 = vmatpush3.msra.mxu1 %v365_v29 }
 0x13f   :  { %1529 = vmatprep.subr.mxu1 %v1440_v26 }
 0x140   :  { %1530 = vmatpush3.msra.mxu1 %v1440_v26 }
 0x141   :  { %1532 = vmatmul.mubr.msk.f32.vlgmr.msra.gmra.mxu1 %vm404_vm8, %v1683_v39  ;;  %1534 = vmatprep.subr.mxu1 %v1452_v34 }
 0x142   :  { %1535 = vmatpush3.msra.mxu1 %v1452_v34  ;;  %1540 = vmatprep.mubr.msk.f32.mxu1 %vm404_vm8, %v1732_v6 }
 0x143   :  { %1536 = vmatprep.subr.mxu1 %v395_v35 }
 0x144   :  { %1537 = vmatpush3.msra.mxu1 %v395_v35 }
 0x145   :  { %1538 = vmatprep.subr.mxu1 %v1449_v32 }
 0x146   :  { %1539 = vmatpush3.msra.mxu1 %v1449_v32 }
 0x147   :  { %1541 = vmatmul.mubr.msk.f32.vlgmr.msra.gmra.mxu1 %vm404_vm8, %v1683_v39 }
 0x1b9   :  { %v1461_v36 = vpop.f32.mrf.mxu1 }
 0x1ba   :  { %v793_v51 = vmul.f32 %v1461_v36, %v1461_v36 }
 0x1bb   :  { %v477_v37 = vpop.f32.mrf.mxu1 }
 0x1bc   :  { %v792_v49 = vmul.f32 %v477_v37, %v477_v37  ;;  %v795_v56 = vmul.f32 0.012345679, %v793_v51 }
 0x1be   :  { %v794_v55 = vmul.f32 0.012345679, %v792_v49 }
 0x1c5   :  { %v1470_v38 = vpop.f32.mrf.mxu1 }
 0x1c6   :  { %v799_v48 = vmul.f32 %v1470_v38, %v1470_v38  ;;  %v787_v23 = vmul.f32 %v1470_v38, %v1461_v36 }
 0x1c7   :  { %v552_v40 = vpop.f32.mrf.mxu1 }
 0x1c8   :  { %v798_v50 = vmul.f32 %v552_v40, %v552_v40  ;;  %v801_v53 = vmul.f32 0.012345679, %v799_v48  ;;  %v786_v21 = vmul.f32 %v552_v40, %v477_v37  ;;  %v789_v27 = vmul.f32 0.012345679, %v787_v23 }
 0x1ca   :  { %v800_v39 = vmul.f32 0.012345679, %v798_v50  ;;  %v788_v25 = vmul.f32 0.012345679, %v786_v21 }
 0x1d1   :  { %v1479_v41 = vpop.f32.mrf.mxu1 }
 0x1d2   :  { %v797_v61 = vsub.f32 %v1479_v41, %v795_v56 }
 0x1d3   :  { %v627_v42 = vpop.f32.mrf.mxu1 }
 0x1d4   :  { %v796_v60 = vsub.f32 %v627_v42, %v794_v55 }
 0x1dd   :  { %v1488_v43 = vpop.f32.mrf.mxu1 }
 0x1de   :  { %v803_v58 = vsub.f32 %v1488_v43, %v801_v53 }
 0x1df   :  { %v702_v44 = vpop.f32.mrf.mxu1 }
 0x1e0   :  { %v802_v57 = vsub.f32 %v702_v44, %v800_v39  ;;  %v807_v3 = vmul.f32 %v803_v58, %v797_v61 }
 0x1e2   :  { %v806_v63 = vmul.f32 %v802_v57, %v796_v60  ;;  %v809_v9 = vadd.f32 1e-05, %v807_v3 }
 0x1e4   :  { %v808_v1 = vadd.f32 1e-05, %v806_v63 }
 0x1e6   :  { %1545 = vrcp.f32 %v808_v1 }
 0x1e7   :  { %1547 = vrcp.f32 %v809_v9 }
 0x1e9   :  { %v1497_v45 = vpop.f32.mrf.mxu1 }
 0x1ea   :  { %v791_v31 = vsub.f32 %v1497_v45, %v789_v27 }
 0x1eb   :  { %v777_v46 = vpop.f32.mrf.mxu1 }
 0x1ec   :  { %v790_v28 = vsub.f32 %v777_v46, %v788_v25  ;;  %v805_v43 = vmul.f32 %v791_v31, %v791_v31 }
 0x1ee   :  { %v804_v34 = vmul.f32 %v790_v28, %v790_v28 }
 0x1ef   :  { %v1506_v47 = vpop.f32.mrf.mxu1 }
 0x1f0   :  { %v1198_v0 = vmul.f32 %v1506_v47, %v1506_v47 }
 0x1f1   :  { %v882_v52 = vpop.f32.mrf.mxu1 }
 0x1f2   :  { %v1197_v4 = vmul.f32 %v882_v52, %v882_v52  ;;  %v1200_v7 = vmul.f32 0.012345679, %v1198_v0 }
 0x1f3   :  { %v1546_v33 = vpop.eup %1545 }
 0x1f4   :  { %v1199_v11 = vmul.f32 0.012345679, %v1197_v4  ;;  %v1548_v42 = vpop.eup %1547  ;;  %v812_v37 = vmul.f32 %v1546_v33, %v804_v34 }
 0x1f5   :  { %v1515_v54 = vpop.f32.mrf.mxu1  ;;  %v813_v36 = vmul.f32 %v1548_v42, %v805_v43 }
 0x1f6   :  { %v1204_v2 = vmul.f32 %v1515_v54, %v1515_v54  ;;  %v1192_v29 = vmul.f32 %v1515_v54, %v1506_v47 }
 0x1f7   :  { %v957_v59 = vpop.f32.mrf.mxu1  ;;  %v815_v49 = vadd.f32 %v813_v36, %v812_v37 }
 0x1f8   :  { %v1203_v5 = vmul.f32 %v957_v59, %v957_v59  ;;  %v1206_v8 = vmul.f32 0.012345679, %v1204_v2  ;;  %v1191_v26 = vmul.f32 %v957_v59, %v882_v52  ;;  %v1194_v35 = vmul.f32 0.012345679, %v1192_v29 }
 0x1fa   :  { %v1205_v12 = vmul.f32 0.012345679, %v1203_v5  ;;  %v1193_v32 = vmul.f32 0.012345679, %v1191_v26 }
 0x1fb   :  { %v1524_v62 = vpop.f32.mrf.mxu1 }
 0x1fc   :  { %v1202_v13 = vsub.f32 %v1524_v62, %v1200_v7 }
 0x1fd   :  { %v1032_v6 = vpop.f32.mrf.mxu1 }
 0x1fe   :  { %v1201_v16 = vsub.f32 %v1032_v6, %v1199_v11 }
 0x201   :  { %v1533_v10 = vpop.f32.mrf.mxu1 }
 0x202   :  { %v1208_v14 = vsub.f32 %v1533_v10, %v1206_v8 }
 0x203   :  { %v1107_v15 = vpop.f32.mrf.mxu1 }
 0x204   :  { %v1212_v17 = vmul.f32 %v1208_v14, %v1202_v13  ;;  %v1207_v18 = vsub.f32 %v1107_v15, %v1205_v12 }
 0x206   :  { %v1214_v19 = vadd.f32 1e-05, %v1212_v17  ;;  %v1211_v20 = vmul.f32 %v1207_v18, %v1201_v16 }
 0x207   :  { %v1542_v24 = vpop.f32.mrf.mxu1 }
 0x208   :  { %v1213_v22 = vadd.f32 1e-05, %v1211_v20  ;;  %1549 = vrcp.f32 %v1214_v19  ;;  %v1196_v40 = vsub.f32 %v1542_v24, %v1194_v35 }
 0x209   :  { %v1182_v30 = vpop.f32.mrf.mxu1 }
 0x20a   :  { %1551 = vrcp.f32 %v1213_v22  ;;  %v1195_v41 = vsub.f32 %v1182_v30, %v1193_v32  ;;  %v1210_v50 = vmul.f32 %v1196_v40, %v1196_v40 }
 0x20c   :  { %v1209_v38 = vmul.f32 %v1195_v41, %v1195_v41 }
 0x215   :  { %v1550_v44 = vpop.eup %1549 }
 0x216   :  { %v1218_v46 = vmul.f32 %v1550_v44, %v1210_v50 }
 0x217   :  { %v1552_v48 = vpop.eup %1551 }
 0x218   :  { %v1217_v51 = vmul.f32 %v1552_v48, %v1209_v38 }
 0x21a   :  { %v1219_v47 = vadd.f32 %v1217_v51, %v815_v49 }
 0x21c   :  { %v1220_v52 = vadd.f32 %v1219_v47, %v1218_v46 }
 0x21e   :  { %1221 = vst [vmem:[%s1787_s2] sm:$0xff] %v1220_v52 }

</bundles_post_ra>
